<compile_context>
chip_gen: v6e
topology: v6e:2x2x1
jax: 0.10.0
libtpu: 0.0.40
codegen_flags: <defaults>
</compile_context>

<pallas_src>
import functools

import jax
import jax.numpy as jnp
from jax.experimental import pallas as pl
from jax.experimental.pallas import tpu as pltpu

_MiB = 1024 * 1024


def _pick_batch_tile(b):
    """Largest TB <= 8 that divides B with B // TB >= 2 (megacore gets >=2 blocks)."""
    for tb in range(min(8, max(1, b // 2)), 0, -1):
        if b % tb == 0:
            return tb
    return 1


def _vmem_capacity_bytes():
    try:
        return int(pltpu.get_tpu_info().vmem_capacity_bytes)
    except Exception:
        return 64 * _MiB    # conservative (v7x-sized) fallback


def distill_loss_kernel(xa_ref, xb_ref, wt_ref, ws_ref, out_ref,
                        acc_a_ref, acc_b_ref,
                        *, inv_seq_len, sub, seq_rem):
    """Grid = (batch_blocks, seq_blocks); seq (reduction) axis is last."""
    s = pl.program_id(1)
    tb, ts, kh = xa_ref.shape

    @pl.when(s == 0)
    def _init():
        acc_a_ref[...] = jnp.zeros_like(acc_a_ref)
        acc_b_ref[...] = jnp.zeros_like(acc_b_ref)

    xa = xa_ref[...]
    xb = xb_ref[...]

    if seq_rem:
        # Ragged seq tail (S_g % TS != 0): the boundary block reads past the true
        # array; zero out the stale rows.  This branch is compiled in only for
        # ragged configs, so divisible shapes pay nothing.
        valid = jnp.where(s == pl.num_programs(1) - 1, seq_rem, ts)
        row = jax.lax.broadcasted_iota(jnp.int32, (tb, ts, kh), 1)
        keep = row < valid
        zero = jnp.zeros((), dtype=xa.dtype)
        xa = jnp.where(keep, xa, zero)
        xb = jnp.where(keep, xb, zero)

    # Hot loop: accumulate pooled sums in f32.  Keep the native sublane axis in the
    # accumulator so each step is plain vreg adds (reduce only over the chunk axis);
    # the cross-sublane (XLU) collapse happens once, in the finalize.
    # TODO(synk): if still VALU-bound on v7x, offload this reduction to the idle MXU
    # via a bf16 ones-vector contraction.
    if sub > 1:
        acc_a_ref[...] += jnp.sum(xa.reshape(tb, ts // sub, sub, kh),
                                  axis=1, dtype=jnp.float32)
        acc_b_ref[...] += jnp.sum(xb.reshape(tb, ts // sub, sub, kh),
                                  axis=1, dtype=jnp.float32)
    else:
        acc_a_ref[...] += jnp.sum(xa, axis=1, keepdims=True, dtype=jnp.float32)
        acc_b_ref[...] += jnp.sum(xb, axis=1, keepdims=True, dtype=jnp.float32)

    @pl.when(s == pl.num_programs(1) - 1)
    def _finalize():
        # Collapse sublane axis, fold 1/S in once -> mean-pooled representations.
        pooled_a = jnp.sum(acc_a_ref[...], axis=1) * inv_seq_len   # (TB, k*H)
        pooled_b = jnp.sum(acc_b_ref[...], axis=1) * inv_seq_len
        # Two tiny MXU dots (MXU otherwise idle); the lane-group fold is carried by
        # the vertically tiled weights, so no in-kernel lane shuffles or concat.
        # TODO(synk): forward-only; training use needs a custom_vjp (teacher no_grad,
        # gradients through the student), matching the torch module's backward.
        diff = (jnp.dot(pooled_a, wt_ref[...], preferred_element_type=jnp.float32)
                - jnp.dot(pooled_b, ws_ref[...], preferred_element_type=jnp.float32))
        partial = jnp.sum(diff * diff)            # per-batch-block sum of squares
        # Lane-dense, sublane-aligned (1, 8, 128) store; wrapper reads [b, 0, 0].
        out_ref[...] = jnp.full(out_ref.shape, partial, dtype=out_ref.dtype)


def distill_loss(sentence_features, labels, w_teacher, w_student, *, tile_bytes=None):
    """MSE(teacher_emb, student_emb). `labels` kept for signature parity (unused)."""
    del labels
    xa, xb = sentence_features            # each [B, S, H] (f32 or bf16)
    B, S, H = xa.shape
    D = w_teacher.shape[1]
    itemsize = jnp.dtype(xa.dtype).itemsize

    vmem_cap = _vmem_capacity_bytes()
    if tile_bytes is None:
        # Bigger tiles on the 128 MiB parts (v5e/v6e); keep the double-buffered
        # footprint (2 inputs x 2 buffers x tile) well inside v7x's 64 MiB.
        tile_bytes = 8 * _MiB if vmem_cap >= 128 * _MiB else 4 * _MiB
    vmem_limit = min(int(vmem_cap * 3 // 4), 96 * _MiB)

    # ---- lane densification: [B,S,H] -> [B, S/k, k*H], k*H a multiple of 128.
    # Contiguous-layout reshape (no HBM pass).  Lane group g holds seq positions
    # s = t*k + g, so summing over groups recovers the full pooled sum.
    if H < 128 and 128 % H == 0 and S % (128 // H) == 0:
        k = 128 // H
    else:
        k = 1                             # already lane-dense, or no clean grouping
    KH = k * H
    S_g = S // k
    if k > 1:
        xa = xa.reshape(B, S_g, KH)
        xb = xb.reshape(B, S_g, KH)

    # Fold the k-group sum into the projection: W_big[g*H + h, :] = W[h, :].
    wt_big = jnp.tile(w_teacher.astype(jnp.float32), (k, 1))     # (KH, D)
    ws_big = jnp.tile(w_student.astype(jnp.float32), (k, 1))

    # ---- tile selection (no wrapper-side padding of the token tensors) ----
    TB = _pick_batch_tile(B)              # divides B; B//TB >= 2 whenever B >= 2
    sub_native = {4: 8, 2: 16, 1: 32}.get(itemsize, 8)
    max_rows = max(sub_native,
                   (tile_bytes // (TB * KH * itemsize)) // sub_native * sub_native)
    TS = S_g if S_g <= max_rows else max_rows     # multiple of sub_native when tiled
    nb = B // TB
    ns = pl.cdiv(S_g, TS)
    seq_rem = S_g % TS                    # ragged tail -> masked in-kernel, no jnp.pad
    SUB = sub_native if TS % sub_native == 0 else (8 if TS % 8 == 0 else 1)

    kernel = functools.partial(distill_loss_kernel,
                               inv_seq_len=1.0 / S, sub=SUB, seq_rem=seq_rem)

    partials = pl.pallas_call(
        kernel,
        out_shape=jax.ShapeDtypeStruct((nb, 8, 128), jnp.float32),
        grid_spec=pltpu.PrefetchScalarGridSpec(
            num_scalar_prefetch=0,
            grid=(nb, ns),                                       # reduction axis last
            in_specs=[
                pl.BlockSpec((TB, TS, KH), lambda b, s: (b, s, 0)),
                pl.BlockSpec((TB, TS, KH), lambda b, s: (b, s, 0)),
                pl.BlockSpec((KH, D), lambda b, s: (0, 0)),      # weights stay resident
                pl.BlockSpec((KH, D), lambda b, s: (0, 0)),
            ],
            out_specs=pl.BlockSpec((1, 8, 128), lambda b, s: (b, 0, 0)),
            scratch_shapes=[
                pltpu.VMEM((TB, SUB, KH), jnp.float32),   # pooled-sum acc (teacher)
                pltpu.VMEM((TB, SUB, KH), jnp.float32),   # pooled-sum acc (student)
            ],
        ),
        compiler_params=pltpu.CompilerParams(
            dimension_semantics=("parallel", "arbitrary"),   # batch blocks across TCs
            vmem_limit_bytes=vmem_limit,
        ),
        cost_estimate=pl.CostEstimate(
            flops=4 * B * S_g * KH + 4 * B * KH * D,
            transcendentals=0,
            bytes_accessed=(2 * B * S_g * KH * itemsize
                            + 2 * KH * D * 4 + nb * 8 * 128 * 4),
        ),
    )(xa, xb, wt_big, ws_big)

    # MSE 'mean' denominator applied once, outside the kernel, with true B*D.
    return jnp.sum(partials[:, 0, 0]) / (B * D)


def _ref_loss(xa, xb, wt, ws, seq_len):
    emb_a = (jnp.sum(xa.astype(jnp.float32), axis=1) / seq_len) @ wt
    emb_b = (jnp.sum(xb.astype(jnp.float32), axis=1) / seq_len) @ ws
    return jnp.mean((emb_a - emb_b) ** 2)


if __name__ == "__main__":
    key = jax.random.PRNGKey(0)
    k_xa, k_xb, k_wt, k_ws, k_xa2, k_xb2 = jax.random.split(key, 6)

    # ---- small demo shapes (module-consistent): batch=2, seq=8, hidden=32, emb=32 ----
    B, S, H, D = 2, 8, 32, 32
    # Tokens streamed as bf16 (halves HBM traffic); all in-kernel accumulation is f32.
    xa = jax.random.normal(k_xa, (B, S, H), dtype=jnp.float32).astype(jnp.bfloat16)
    xb = jax.random.normal(k_xb, (B, S, H), dtype=jnp.float32).astype(jnp.bfloat16)
    w_teacher = jax.random.normal(k_wt, (H, D), dtype=jnp.float32) / jnp.sqrt(H)
    w_student = jax.random.normal(k_ws, (H, D), dtype=jnp.float32) / jnp.sqrt(H)
    labels = jnp.zeros((B,), dtype=jnp.float32)   # unused, as in the torch module

    loss = distill_loss((xa, xb), labels, w_teacher, w_student)
    jax.block_until_ready(loss)
    loss_ref = _ref_loss(xa, xb, w_teacher, w_student, S)
    assert jnp.allclose(loss, loss_ref, rtol=1e-4, atol=1e-6), (loss, loss_ref)

    # ---- second config: exercises multi-step seq streaming, the sublane-structured
    # accumulator (SUB=16), the ragged-tail in-kernel mask, and TB > 1. ----
    B2, S2 = 4, 136
    xa2 = jax.random.normal(k_xa2, (B2, S2, H), dtype=jnp.float32).astype(jnp.bfloat16)
    xb2 = jax.random.normal(k_xb2, (B2, S2, H), dtype=jnp.float32).astype(jnp.bfloat16)
    loss2 = distill_loss((xa2, xb2), labels, w_teacher, w_student,
                         tile_bytes=16 * 1024)
    jax.block_until_ready(loss2)
    loss2_ref = _ref_loss(xa2, xb2, w_teacher, w_student, S2)
    assert jnp.allclose(loss2, loss2_ref, rtol=1e-4, atol=1e-6), (loss2, loss2_ref)

    print("KERNEL_OK")
</pallas_src>

<mosaic_0001>
module attributes {stable_mosaic.version = 11 : i64} {
  func.func @distill_loss_kernel(%arg0: i32, %arg1: i32, %arg2: memref<1x2x128xbf16, #tpu.memory_space<vmem>>, %arg3: memref<1x2x128xbf16, #tpu.memory_space<vmem>>, %arg4: memref<128x32xf32, #tpu.memory_space<vmem>>, %arg5: memref<128x32xf32, #tpu.memory_space<vmem>>, %arg6: memref<1x8x128xf32, #tpu.memory_space<vmem>>, %arg7: memref<1x1x128xf32, #tpu.memory_space<vmem>>, %arg8: memref<1x1x128xf32, #tpu.memory_space<vmem>>) attributes {dimension_semantics = [#tpu.dimension_semantics<parallel>, #tpu.dimension_semantics<arbitrary>], iteration_bounds = array<i64: 2, 1>, scalar_prefetch = 0 : i64, scratch_operands = 2 : i64, tpu.core_type = #tpu.core_type<tc>, window_params = [{transform_indices = @transform_0, window_bounds = array<i64: 1, 2, 128>}, {transform_indices = @transform_1, window_bounds = array<i64: 1, 2, 128>}, {pipeline_mode = #tpu.pipeline_mode<synchronous>, transform_indices = @transform_2, window_bounds = array<i64: 128, 32>}, {pipeline_mode = #tpu.pipeline_mode<synchronous>, transform_indices = @transform_3, window_bounds = array<i64: 128, 32>}, {transform_indices = @transform_4, window_bounds = array<i64: 1, 8, 128>}]} {
    %c0_i32 = arith.constant 0 : i32
    %0 = arith.cmpi eq, %arg1, %c0_i32 : i32
    %1 = arith.extui %0 : i1 to i32
    %c0_i32_0 = arith.constant 0 : i32
    %2 = arith.cmpi ne, %1, %c0_i32_0 : i32
    scf.if %2 {
      %cst_21 = arith.constant 0.000000e+00 : f32
      %20 = vector.broadcast %cst_21 : f32 to vector<1x1x128xf32>
      %c0_22 = arith.constant 0 : index
      %c0_23 = arith.constant 0 : index
      %c0_24 = arith.constant 0 : index
      %21 = vector.load %arg7[%c0_22, %c0_23, %c0_24] : memref<1x1x128xf32, #tpu.memory_space<vmem>>, vector<1x1x128xf32>
      tpu.vector_store %arg7[%c0_22, %c0_23, %c0_24], %20 {strides = array<i32>} : memref<1x1x128xf32, #tpu.memory_space<vmem>>, vector<1x1x128xf32>,
      %cst_25 = arith.constant 0.000000e+00 : f32
      %22 = vector.broadcast %cst_25 : f32 to vector<1x1x128xf32>
      %c0_26 = arith.constant 0 : index
      %c0_27 = arith.constant 0 : index
      %c0_28 = arith.constant 0 : index
      %23 = vector.load %arg8[%c0_26, %c0_27, %c0_28] : memref<1x1x128xf32, #tpu.memory_space<vmem>>, vector<1x1x128xf32>
      tpu.vector_store %arg8[%c0_26, %c0_27, %c0_28], %22 {strides = array<i32>} : memref<1x1x128xf32, #tpu.memory_space<vmem>>, vector<1x1x128xf32>,
    } else {
    }
    %c0 = arith.constant 0 : index
    %c0_1 = arith.constant 0 : index
    %c0_2 = arith.constant 0 : index
    %3 = vector.load %arg2[%c0, %c0_1, %c0_2] : memref<1x2x128xbf16, #tpu.memory_space<vmem>>, vector<1x2x128xbf16>
    %c0_3 = arith.constant 0 : index
    %c0_4 = arith.constant 0 : index
    %c0_5 = arith.constant 0 : index
    %4 = vector.load %arg3[%c0_3, %c0_4, %c0_5] : memref<1x2x128xbf16, #tpu.memory_space<vmem>>, vector<1x2x128xbf16>
    %c0_6 = arith.constant 0 : index
    %c0_7 = arith.constant 0 : index
    %c0_8 = arith.constant 0 : index
    %5 = vector.load %arg7[%c0_6, %c0_7, %c0_8] : memref<1x1x128xf32, #tpu.memory_space<vmem>>, vector<1x1x128xf32>
    %6 = arith.extf %3 : vector<1x2x128xbf16> to vector<1x2x128xf32>
    %cst = arith.constant dense<0.000000e+00> : vector<1x128xf32>
    %7 = vector.multi_reduction <add>, %6, %cst [1] : vector<1x2x128xf32> to vector<1x128xf32>
    %8 = vector.shape_cast %7 : vector<1x128xf32> to vector<1x1x128xf32>
    %9 = arith.addf %5, %8 : vector<1x1x128xf32>
    %c0_9 = arith.constant 0 : index
    %c0_10 = arith.constant 0 : index
    %c0_11 = arith.constant 0 : index
    %10 = vector.load %arg7[%c0_9, %c0_10, %c0_11] : memref<1x1x128xf32, #tpu.memory_space<vmem>>, vector<1x1x128xf32>
    tpu.vector_store %arg7[%c0_9, %c0_10, %c0_11], %9 {strides = array<i32>} : memref<1x1x128xf32, #tpu.memory_space<vmem>>, vector<1x1x128xf32>,
    %c0_12 = arith.constant 0 : index
    %c0_13 = arith.constant 0 : index
    %c0_14 = arith.constant 0 : index
    %11 = vector.load %arg8[%c0_12, %c0_13, %c0_14] : memref<1x1x128xf32, #tpu.memory_space<vmem>>, vector<1x1x128xf32>
    %12 = arith.extf %4 : vector<1x2x128xbf16> to vector<1x2x128xf32>
    %cst_15 = arith.constant dense<0.000000e+00> : vector<1x128xf32>
    %13 = vector.multi_reduction <add>, %12, %cst_15 [1] : vector<1x2x128xf32> to vector<1x128xf32>
    %14 = vector.shape_cast %13 : vector<1x128xf32> to vector<1x1x128xf32>
    %15 = arith.addf %11, %14 : vector<1x1x128xf32>
    %c0_16 = arith.constant 0 : index
    %c0_17 = arith.constant 0 : index
    %c0_18 = arith.constant 0 : index
    %16 = vector.load %arg8[%c0_16, %c0_17, %c0_18] : memref<1x1x128xf32, #tpu.memory_space<vmem>>, vector<1x1x128xf32>
    tpu.vector_store %arg8[%c0_16, %c0_17, %c0_18], %15 {strides = array<i32>} : memref<1x1x128xf32, #tpu.memory_space<vmem>>, vector<1x1x128xf32>,
    %c0_i32_19 = arith.constant 0 : i32
    %17 = arith.cmpi eq, %arg1, %c0_i32_19 : i32
    %18 = arith.extui %17 : i1 to i32
    %c0_i32_20 = arith.constant 0 : i32
    %19 = arith.cmpi ne, %18, %c0_i32_20 : i32
    scf.if %19 {
      %c0_21 = arith.constant 0 : index
      %c0_22 = arith.constant 0 : index
      %c0_23 = arith.constant 0 : index
      %20 = vector.load %arg7[%c0_21, %c0_22, %c0_23] : memref<1x1x128xf32, #tpu.memory_space<vmem>>, vector<1x1x128xf32>
      %cst_24 = arith.constant dense<0.000000e+00> : vector<1x128xf32>
      %21 = vector.multi_reduction <add>, %20, %cst_24 [1] : vector<1x1x128xf32> to vector<1x128xf32>
      %cst_25 = arith.constant 1.250000e-01 : f32
      %22 = vector.broadcast %cst_25 : f32 to vector<1x128xf32>
      %23 = arith.mulf %21, %22 : vector<1x128xf32>
      %c0_26 = arith.constant 0 : index
      %c0_27 = arith.constant 0 : index
      %c0_28 = arith.constant 0 : index
      %24 = vector.load %arg8[%c0_26, %c0_27, %c0_28] : memref<1x1x128xf32, #tpu.memory_space<vmem>>, vector<1x1x128xf32>
      %cst_29 = arith.constant dense<0.000000e+00> : vector<1x128xf32>
      %25 = vector.multi_reduction <add>, %24, %cst_29 [1] : vector<1x1x128xf32> to vector<1x128xf32>
      %cst_30 = arith.constant 1.250000e-01 : f32
      %26 = vector.broadcast %cst_30 : f32 to vector<1x128xf32>
      %27 = arith.mulf %25, %26 : vector<1x128xf32>
      %c0_31 = arith.constant 0 : index
      %c0_32 = arith.constant 0 : index
      %28 = vector.load %arg4[%c0_31, %c0_32] : memref<128x32xf32, #tpu.memory_space<vmem>>, vector<128x32xf32>
      %cst_33 = arith.constant dense<0.000000e+00> : vector<1x32xf32>
      %29 = tpu.matmul %23, %28, %cst_33 {dimension_numbers = #tpu.dot_dimension_numbers<[1], [0], [0], [1], [0, 0, 1, 1], [], []>} : vector<1x128xf32>, vector<128x32xf32>, vector<1x32xf32> -> vector<1x32xf32>
      %c0_34 = arith.constant 0 : index
      %c0_35 = arith.constant 0 : index
      %30 = vector.load %arg5[%c0_34, %c0_35] : memref<128x32xf32, #tpu.memory_space<vmem>>, vector<128x32xf32>
      %cst_36 = arith.constant dense<0.000000e+00> : vector<1x32xf32>
      %31 = tpu.matmul %27, %30, %cst_36 {dimension_numbers = #tpu.dot_dimension_numbers<[1], [0], [0], [1], [0, 0, 1, 1], [], []>} : vector<1x128xf32>, vector<128x32xf32>, vector<1x32xf32> -> vector<1x32xf32>
      %32 = arith.subf %29, %31 : vector<1x32xf32>
      %33 = arith.mulf %32, %32 : vector<1x32xf32>
      %34 = vector.shape_cast %33 : vector<1x32xf32> to vector<1x1x32xf32>
      %cst_37 = arith.constant dense<0.000000e+00> : vector<1xf32>
      %35 = vector.multi_reduction <add>, %34, %cst_37 [1, 2] : vector<1x1x32xf32> to vector<1xf32>
      %36 = vector.shape_cast %35 : vector<1xf32> to vector<1x1x1xf32>
      %37 = vector.extract %36[0, 0, 0] : f32 from vector<1x1x1xf32>
      %38 = vector.broadcast %37 : f32 to vector<1x8x128xf32>
      %c0_38 = arith.constant 0 : index
      %c0_39 = arith.constant 0 : index
      %c0_40 = arith.constant 0 : index
      %39 = vector.load %arg6[%c0_38, %c0_39, %c0_40] : memref<1x8x128xf32, #tpu.memory_space<vmem>>, vector<1x8x128xf32>
      tpu.vector_store %arg6[%c0_38, %c0_39, %c0_40], %38 {strides = array<i32>} : memref<1x8x128xf32, #tpu.memory_space<vmem>>, vector<1x8x128xf32>,
    } else {
    }
    return
  }
  func.func @transform_0(%arg0: i32, %arg1: i32) -> (i32, i32, i32) {
    %c0_i32 = arith.constant 0 : i32
    %c0_i32_0 = arith.constant 0 : i32
    return %arg0, %arg1, %c0_i32 : i32, i32, i32
  }
  func.func @transform_1(%arg0: i32, %arg1: i32) -> (i32, i32, i32) {
    %c0_i32 = arith.constant 0 : i32
    %c0_i32_0 = arith.constant 0 : i32
    return %arg0, %arg1, %c0_i32 : i32, i32, i32
  }
  func.func @transform_2(%arg0: i32, %arg1: i32) -> (i32, i32) {
    %c0_i32 = arith.constant 0 : i32
    %c0_i32_0 = arith.constant 0 : i32
    %c0_i32_1 = arith.constant 0 : i32
    return %c0_i32, %c0_i32_0 : i32, i32
  }
  func.func @transform_3(%arg0: i32, %arg1: i32) -> (i32, i32) {
    %c0_i32 = arith.constant 0 : i32
    %c0_i32_0 = arith.constant 0 : i32
    %c0_i32_1 = arith.constant 0 : i32
    return %c0_i32, %c0_i32_0 : i32, i32
  }
  func.func @transform_4(%arg0: i32, %arg1: i32) -> (i32, i32, i32) {
    %c0_i32 = arith.constant 0 : i32
    %c0_i32_0 = arith.constant 0 : i32
    %c0_i32_1 = arith.constant 0 : i32
    return %arg0, %c0_i32, %c0_i32_0 : i32, i32, i32
  }
}

</mosaic_0001>

<bundles_post_ra>
// kernel: tpu_custom_call.1
= control target key start
LH: loop header
LB: loop body
LE: loop exit
PB: predicated region body
PF: predicated region fallthrough
CT: control target
= control target key end

     0   :  { %9 = vsyncpa [#allocation5], 0  ;;  %s1085_s0 = inlined_call_operand.vmem [shape: bf16[2,2,128], index: 0, kind: input, shape index: {}]   ;;  %s1086_s1 = inlined_call_operand.vmem [shape: bf16[2,2,128], index: 1, kind: input, shape index: {}]   ;;  %s1087_s2 = inlined_call_operand.vmem [shape: f32[128,32], index: 2, kind: input, shape index: {}]   ;;  %s1088_s3 = inlined_call_operand.vmem [shape: f32[128,32], index: 3, kind: input, shape index: {}]   ;;  %s1089_s4 = inlined_call_operand.hbm [shape: f32[2,8,128], index: 4, kind: output, shape index: {}]  }
   0x1   :  { %11 = vsyncpa [#allocation5 + $0x1], 0  ;;  %s837_s15 = smov 0   ;;  %s839_s16 = smov 0  }
   0x2   :  { %s841_s17 = smov 0   ;;  %s843_s18 = smov 0  }
   0x3   :  { %s845_s19 = smov 0   ;;  %s847_s20 = smov 0  }
   0x4 LB: > { %s558_s21 = sadd.s32 4294967295, %s807_s20   ;;  %s559_s22 = sadd.s32 4294967294, %s807_s20   ;;  %s807_s20 = sphi %s847_s20, %s17_s20   ;;  %s803_s19 = sphi %s845_s19, %s1096_s19   ;;  %s799_s18 = sphi %s843_s18, %s1095_s18   ;;  %s795_s17 = sphi %s841_s17, %s1094_s17   ;;  %s791_s16 = sphi %s839_s16, %s1093_s16   ;;  %s787_s15 = sphi %s837_s15, %s1092_s15  }
   0x5   : > { %s29_s23 = sadd.s32 1, %s803_s19  ;;  %s134_s24 = sadd.s32 1, %s795_s17 }
   0x6   : > { %p31_p0 = scmp.ge.s32.totalorder %s29_s23, 2  ;;  %p144_p1 = scmp.ne.s32.totalorder %s795_s17, %s791_s16 }
   0x7   : > { %p145_p2 = scmp.eq.s32.totalorder %s558_s21, 1  ;;  %p150_p3 = scmp.ne.s32.totalorder %s791_s16, %s787_s15 }
   0x8   : > { %s1098_s23 = smov (%p31_p0, %s29_s23), 0  ;;  %p151_p5 = scmp.eq.s32.totalorder %s559_s22, 1 }
   0x9   : > { %p877_p4 = por %p145_p2, %p144_p1  ;;  %s131_s26 = ssub.s32 %s803_s19, %s1098_s23 }
   0xa   : > { %p562_p6 = scmp.ge.s32.totalorder %s807_s20, 1  ;;  %p132_p7 = scmp.eq.s32.totalorder %s131_s26, 0 }
   0xb   : > { %p884_p8 = por %p151_p5, %p150_p3  ;;  %p193_p9 = scmp.lt.s32.totalorder %s807_s20, 3 }
   0xc   : > { %s890_s28 = scalar_select %p132_p7, %s795_s17, %s134_s24  }
   0xd   : > { %p194_p10 = pnand %p562_p6, %p193_p9 }
   0xe   : > { %p226_p11 = scmp.lt.s32.totalorder (!%p194_p10), %s799_s18, 1  ;;  %s565_s14 = sshll.u32 (!%p194_p10), %s799_s18, 7 }
   0xf   : > { %197 = sbr.rel (%p194_p10) target bundleno = 466 (0x1d2), region = 36  ;;  %s811_s5 = smov (!%p194_p10), [#allocation4]  }
  0x14   : > { %v293_v0 = vld [vmem:[%s1087_s2 + $0x78] sm:$0xff]  ;;  %v809_v2 = vmov 0.0   ;;  %v292_v3 = vld [vmem:[%s1087_s2 + $0x70] sm:$0xff]  ;;  %v291_v5 = vld [vmem:[%s1087_s2 + $0x68] sm:$0xff]  ;;  %s920_s21 = scalar_select %p226_p11, %s799_s18, 1  ;;  %vm248_vm0 = vcmask 1041408  }
  0x15   : > { %v379_v1 = vld [vmem:[%s1088_s3 + $0x78] sm:$0xff]  ;;  %602 = vmatprep.subr.mxu0 %v809_v2  ;;  %242 = vst [vmem:[#allocation2] sm:$0x1] %v809_v2  ;;  %243 = vst [vmem:[#allocation3] sm:$0x1] %v809_v2  ;;  %637 = vmatprep.subr.mxu1 %v809_v2  ;;  %v378_v4 = vld [vmem:[%s1088_s3 + $0x70] sm:$0xff] }
  0x16   : > { %603 = vmatpush3.msra.mxu0 %v293_v0  ;;  %638 = vmatpush3.msra.mxu1 %v379_v1  ;;  %v377_v6 = vld [vmem:[%s1088_s3 + $0x68] sm:$0xff]  ;;  %v290_v7 = vld [vmem:[%s1087_s2 + $0x60] sm:$0xff]  ;;  %v289_v9 = vld [vmem:[%s1087_s2 + $0x58] sm:$0xff]  ;;  %s231_s10 = scalar_lea.vmem %s1085_s0, %s920_s21  ;;  %s237_s13 = scalar_lea.vmem %s1086_s1, %s920_s21  ;;  %vm810_vm1 = vmmov 0   ;;  %vm452_vm2 = vcmask 253952  }
  0x17   : > { %604 = vmatprep.subr.mxu0 %v809_v2  ;;  %639 = vmatprep.subr.mxu1 %v809_v2  ;;  %v376_v8 = vld [vmem:[%s1088_s3 + $0x60] sm:$0xff]  ;;  %v375_v10 = vld [vmem:[%s1088_s3 + $0x58] sm:$0xff]  ;;  %v288_v11 = vld [vmem:[%s1087_s2 + $0x50] sm:$0xff]  ;;  %s477_s21 = scalar_lea.hbm %s1089_s4, %s565_s14  ;;  %s735_s18 = sshll.u32 %s811_s5, 4  ;;  %s736_s18 = int_to_ptr.vmem [resolvable:$false] %s735_s18 }
  0x18   : > { %605 = vmatpush3.msra.mxu0 %v292_v3  ;;  %640 = vmatpush3.msra.mxu1 %v378_v4  ;;  %v374_v12 = vld [vmem:[%s1088_s3 + $0x50] sm:$0xff]  ;;  %v244_v13 = vld [vmem:[%s231_s10] sm:$0x1]  ;;  %v287_v14 = vld [vmem:[%s1087_s2 + $0x48] sm:$0xff]  ;;  %s223_s10 = sand.u32 1, %s791_s16   ;;  %s737_s6 = scalar_lea.vmem %s736_s18, 256 }
  0x19   : > { %606 = vmatprep.subr.mxu0 %v809_v2  ;;  %641 = vmatprep.subr.mxu1 %v809_v2  ;;  %v373_v15 = vld [vmem:[%s1088_s3 + $0x48] sm:$0xff]  ;;  %v247_v16 = vunpack.c.l.bf16 %v244_v13  ;;  %v245_v17 = vld [vmem:[%s237_s13] sm:$0x1]  ;;  %v285_v24 = vld [vmem:[%s1087_s2 + $0x38] sm:$0xff]  ;;  %s563_s11 = sshll.u32 %s223_s10, 3  ;;  %s466_s29 = scalar_lea.sflag [#allocation5], %s223_s10 }
  0x1a   : > { %607 = vmatpush3.msra.mxu0 %v291_v5  ;;  %642 = vmatpush3.msra.mxu1 %v377_v6  ;;  %v259_v18 = vunpack.c.l.bf16 %v245_v17  ;;  %v286_v19 = vld [vmem:[%s1087_s2 + $0x40] sm:$0xff]  ;;  %v371_v25 = vld [vmem:[%s1088_s3 + $0x38] sm:$0xff]  ;;  %v284_v28 = vld [vmem:[%s1087_s2 + $0x30] sm:$0xff]  ;;  %s225_s12 = scalar_lea.vmem [#allocation4], %s563_s11 }
  0x1b   : > { %608 = vmatprep.subr.mxu0 %v809_v2  ;;  %643 = vmatprep.subr.mxu1 %v809_v2  ;;  %v372_v20 = vld [vmem:[%s1088_s3 + $0x40] sm:$0xff]  ;;  %v249_v21 = vsel %vm248_vm0, %v247_v16, 0.0  ;;  %v370_v29 = vld [vmem:[%s1088_s3 + $0x30] sm:$0xff]  ;;  %v283_v32 = vld [vmem:[%s1087_s2 + $0x28] sm:$0xff]  ;;  %s479_s13 = sshll.u32 %s225_s12, 4  ;;  %s1042_s13 = int_to_ptr.vmem [resolvable:$true] %s479_s13 }
  0x1c   : > { %609 = vmatpush3.msra.mxu0 %v290_v7  ;;  %644 = vmatpush3.msra.mxu1 %v376_v8  ;;  %v250_v22 = vrot.slane %v249_v21, 4  ;;  %v260_v23 = vsel %vm248_vm0, %v259_v18, 0.0  ;;  %v369_v33 = vld [vmem:[%s1088_s3 + $0x28] sm:$0xff]  ;;  %v282_v36 = vld [vmem:[%s1087_s2 + $0x20] sm:$0xff]  ;;  %v281_v40 = vld [vmem:[%s1087_s2 + $0x18] sm:$0xff]  ;;  %s731_s30 = scalar_lea.vmem %s1042_s13, 128  ;;  %p738_p1 = scmp.lt.s32.totalorder %s1042_s13, %s736_s18 }
  0x1d   : > { %610 = vmatprep.subr.mxu0 %v809_v2  ;;  %645 = vmatprep.subr.mxu1 %v809_v2  ;;  %v261_v26 = vrot.slane %v260_v23, 4  ;;  %v368_v37 = vld [vmem:[%s1088_s3 + $0x20] sm:$0xff]  ;;  %v367_v41 = vld [vmem:[%s1088_s3 + $0x18] sm:$0xff]  ;;  %v280_v46 = vld [vmem:[%s1087_s2 + $0x10] sm:$0xff]  ;;  %p732_p12 = scmp.ne.s32.totalorder %s1042_s13, %s731_s30  ;;  %p739_p2 = scmp.lt.s32.totalorder %s737_s6, %s731_s30 }
  0x1e   : > { %611 = vmatpush3.msra.mxu0 %v289_v9  ;;  %646 = vmatpush3.msra.mxu1 %v375_v10  ;;  %v251_v27 = vadd.f32 %v250_v22, %v249_v21  ;;  %v246_v42 = vld [vmem:[#allocation2] sm:$0x1]  ;;  %v258_v45 = vld [vmem:[#allocation3] sm:$0x1]  ;;  %v366_v47 = vld [vmem:[%s1088_s3 + $0x10] sm:$0xff] }
  0x1f   : > { %612 = vmatprep.subr.mxu0 %v809_v2  ;;  %647 = vmatprep.subr.mxu1 %v809_v2  ;;  %v262_v30 = vadd.f32 %v261_v26, %v260_v23  ;;  %v279_v50 = vld [vmem:[%s1087_s2 + $0x8] sm:$0xff]  ;;  %v278_v53 = vld [vmem:[%s1087_s2] sm:$0xff]  ;;  %p733_p13 = pnand %p732_p12, %p877_p4  ;;  %p740_p3 = por %p739_p2, %p738_p1 }
  0x20   : > { %613 = vmatpush3.msra.mxu0 %v288_v11  ;;  %648 = vmatpush3.msra.mxu1 %v374_v12  ;;  %v252_v31 = vrot.slane %v251_v27, 2  ;;  %v365_v51 = vld [vmem:[%s1088_s3 + $0x8] sm:$0xff]  ;;  %v364_v54 = vld [vmem:[%s1088_s3] sm:$0xff] }
  0x21   : > { %614 = vmatprep.subr.mxu0 %v809_v2  ;;  %649 = vmatprep.subr.mxu1 %v809_v2  ;;  %v263_v34 = vrot.slane %v262_v30, 2  ;;  %p734_p0 = pneg %p733_p13 }
  0x22   : > { %615 = vmatpush3.msra.mxu0 %v287_v14  ;;  %650 = vmatpush3.msra.mxu1 %v373_v15  ;;  %v253_v35 = vadd.f32 %v252_v31, %v251_v27 }
  0x23   : > { %616 = vmatprep.subr.mxu0 %v809_v2  ;;  %651 = vmatprep.subr.mxu1 %v809_v2  ;;  %v264_v38 = vadd.f32 %v263_v34, %v262_v30  ;;  %p741_p5 = pnand %p740_p3, %p734_p0 }
  0x24   : > { %617 = vmatpush3.msra.mxu0 %v286_v19  ;;  %652 = vmatpush3.msra.mxu1 %v372_v20  ;;  %v254_v39 = vrot.slane %v253_v35, 1 }
  0x25   : > { %618 = vmatprep.subr.mxu0 %v809_v2  ;;  %653 = vmatprep.subr.mxu1 %v809_v2  ;;  %v265_v43 = vrot.slane %v264_v38, 1 }
  0x26   : > { %619 = vmatpush3.msra.mxu0 %v285_v24  ;;  %654 = vmatpush3.msra.mxu1 %v371_v25  ;;  %v255_v44 = vadd.f32 %v254_v39, %v253_v35 }
  0x27   : > { %620 = vmatprep.subr.mxu0 %v809_v2  ;;  %655 = vmatprep.subr.mxu1 %v809_v2  ;;  %v266_v48 = vadd.f32 %v265_v43, %v264_v38 }
  0x28   : > { %621 = vmatpush3.msra.mxu0 %v284_v28  ;;  %656 = vmatpush3.msra.mxu1 %v370_v29  ;;  %v256_v49 = vadd.f32 %v255_v44, %v246_v42 }
  0x29   : > { %622 = vmatprep.subr.mxu0 %v809_v2  ;;  %657 = vmatprep.subr.mxu1 %v809_v2  ;;  %v267_v52 = vadd.f32 %v266_v48, %v258_v45 }
  0x2a   : > { %623 = vmatpush3.msra.mxu0 %v283_v32  ;;  %658 = vmatpush3.msra.mxu1 %v369_v33  ;;  %257 = vst [vmem:[#allocation2] sm:$0x1] %v256_v49 }
  0x2b   : > { %624 = vmatprep.subr.mxu0 %v809_v2  ;;  %659 = vmatprep.subr.mxu1 %v809_v2  ;;  %268 = vst [vmem:[#allocation3] sm:$0x1] %v267_v52 }
  0x2c   : > { %625 = vmatpush3.msra.mxu0 %v282_v36  ;;  %660 = vmatpush3.msra.mxu1 %v368_v37 }
  0x2d   : > { %626 = vmatprep.subr.mxu0 %v809_v2  ;;  %661 = vmatprep.subr.mxu1 %v809_v2 }
  0x2e   : > { %627 = vmatpush3.msra.mxu0 %v281_v40  ;;  %662 = vmatpush3.msra.mxu1 %v367_v41 }
  0x2f   : > { %628 = vmatprep.subr.mxu0 %v809_v2  ;;  %663 = vmatprep.subr.mxu1 %v809_v2 }
  0x30   : > { %629 = vmatpush3.msra.mxu0 %v280_v46  ;;  %664 = vmatpush3.msra.mxu1 %v366_v47 }
  0x31   : > { %630 = vmatprep.subr.mxu0 %v809_v2  ;;  %665 = vmatprep.subr.mxu1 %v809_v2  ;;  %v272_v55 = vld [vmem:[#allocation2] sm:$0x1] }
  0x32   : > { %631 = vmatpush3.msra.mxu0 %v279_v50  ;;  %666 = vmatpush3.msra.mxu1 %v365_v51  ;;  %v274_v56 = vmul.f32 0.125, %v272_v55  ;;  %v275_v57 = vld [vmem:[#allocation3] sm:$0x1] }
  0x33   : > { %632 = vmatprep.subr.mxu0 %v809_v2  ;;  %667 = vmatprep.subr.mxu1 %v809_v2  ;;  %v277_v58 = vmul.f32 0.125, %v275_v57 }
  0x34   : > { %633 = vmatpush3.msra.mxu0 %v278_v53  ;;  %634 = vmatprep.mubr.msk.f32.mxu0 %vm810_vm1, %v809_v2 }
  0x35   : > { %668 = vmatpush3.msra.mxu1 %v364_v54  ;;  %669 = vmatprep.mubr.msk.f32.mxu1 %vm810_vm1, %v809_v2 }
  0x36   : > { %635 = vmatmul.mubr.f32.vlgmr.msra.gmra.mxu0 %v274_v56  ;;  %670 = vmatmul.mubr.f32.vlgmr.msra.gmra.mxu1 %v277_v58 }
  0xf6   : > { %v360_v59 = vpop.f32.mrf.mxu0  ;;  %v446_v60 = vpop.f32.mrf.mxu1 }
  0xf7   : > { %v450_v61 = vsub.f32 %v360_v59, %v446_v60 }
  0xf8   : > { %v636_v62 = vpop.f32.mrf.mxu0  ;;  %v671_v63 = vpop.f32.mrf.mxu1 }
  0xf9   : > { %v451_v0 = vmul.f32 %v450_v61, %v450_v61 }
  0xfb   : > { %v453_v1 = vsel %vm452_vm2, %v451_v0, 0.0 }
  0xfc   : > { %454 = vadd.xlane.f32.xlu0 %v453_v1 }
 0x185   : > { %v455_v3 = vpop.xlane.xlu0 %454 }
 0x186   : > { %v456_v4 = vrot.slane %v455_v3, 4 }
 0x188   : > { %v457_v2 = vadd.f32 %v456_v4, %v455_v3 }
 0x18a   : > { %v458_v5 = vrot.slane %v457_v2, 2 }
 0x18c   : > { %v459_v6 = vadd.f32 %v458_v5, %v457_v2 }
 0x18e   : > { %v460_v7 = vrot.slane %v459_v6, 1 }
 0x190   : > { %v461_v8 = vadd.f32 %v460_v7, %v459_v6 }
 0x192   : > { %672 = vpush %v461_v8 }
 0x1c3   : > { %s673_s22 = spop %672 }
 0x1c4   : > { %v463_v9 = vstv %s673_s22 }
 0x1c5   : > { %464 = vst [vmem:[%s225_s12] sm:$0xff] %v463_v9 }
 0x1c6   : > { %744 = shalt.err (!%p741_p5)
}
 0x1c7   : > { %s745_s7 = scalar_lea.hbm %s477_s21, 128  ;;  %s749_s10 = scalar_lea.hbm %s1089_s4, 256 }
 0x1c8   : > { %p746_p6 = scmp.ne.s32.totalorder %s477_s21, %s745_s7  ;;  %p750_p10 = scmp.lt.s32.totalorder %s477_s21, %s1089_s4 }
 0x1c9   : > { %p751_p11 = scmp.lt.s32.totalorder %s749_s10, %s745_s7 }
 0x1ca   : > { %p747_p7 = pnand %p746_p6, %p877_p4 }
 0x1cb   : > { %p752_p12 = por %p751_p11, %p750_p10 }
 0x1cc   : > { %p748_p9 = pneg %p747_p7 }
 0x1ce   : > { %p753_p13 = pnand %p752_p12, %p748_p9 }
 0x1d0   : > { %756 = shalt.err (!%p753_p13)
}
 0x1d1   : > { %674 = dma.vmem_to_hbm [thread:$0]  (%p877_p4), %s1042_s13, 128, %s477_s21, %s466_s29  }
 0x1d2 PF: > { %p680_p0 = scmp.ge.s32.totalorder %s807_s20, 2  ;;  %s491_s14 = sand.u32 1, %s787_s15  }
 0x1d3   : > { %s492_s22 = scalar_lea.sflag [#allocation5], %s491_s14 }
 0x1d4   : > { %p677_p1 = pnand %p680_p0, %p884_p8 }
 0x1d6   : > { %p678_p2 = pneg %p677_p1 }
 0x1d8   : > { %782 = dma.done.wait (%p678_p2), %s492_s22, 128  }
 0x1d9   : > { %784 = vsyncadd (%p678_p2), %s492_s22, 4294967168  ;;  %s17_s20 = sadd.s32 1, %s807_s20   ;;  %s1092_s15 = smov %s791_s16 }
 0x1da   : > { %p14_p3 = scmp.ge.s32.totalorder %s17_s20, 4   ;;  %s1093_s16 = smov %s795_s17 }
 0x1db   : > { %s1094_s17 = smov %s890_s28  ;;  %s1095_s18 = smov %s803_s19 }
 0x1dc   : > { %s1096_s19 = smov %s1098_s23  ;;  %16 = sbr.rel (!%p14_p3) target bundleno = 4 (0x4), region = 82 }
 0x1e1   :  { %497 = vsyncpa [#allocation5], 1 }
 0x1e2   :  { %499 = vsyncpa [#allocation5 + $0x1], 1 }

</bundles_post_ra>
